<compile_context>
chip_gen: v5e
topology: v5e:2x2
jax: 0.10.0
libtpu: 0.0.40
codegen_flags: <defaults>
</compile_context>

<pallas_src>
import jax
import jax.numpy as jnp
from jax.experimental import pallas as pl
from jax.experimental.pallas import tpu as pltpu

LANE = 128            # lane width: feature dims padded to multiples of 128
TILE_B_DEFAULT = 512  # large-batch tile (HBM-bound: big tiles -> ~85% of roofline)
SUBLANE_BF16 = 16     # minimal batch padding granule (bf16 sublane packing)


def _round_up(n, m):
    return ((n + m - 1) // m) * m


def mlp_kernel(x_ref, w1_ref, b1_ref, w2_ref, b2_ref, w3_ref, b3_ref, o_ref):
    # fc1 + ReLU: bf16 operands on the MXU, f32 accumulation, f32 elementwise (VPU).
    h1 = jnp.dot(x_ref[...], w1_ref[...], preferred_element_type=jnp.float32)
    h1 = jnp.maximum(h1 + b1_ref[...], 0.0)
    # fc2 + ReLU
    h2 = jnp.dot(h1.astype(jnp.bfloat16), w2_ref[...],
                 preferred_element_type=jnp.float32)
    h2 = jnp.maximum(h2 + b2_ref[...], 0.0)
    # fc3 (logits, no activation)
    out = jnp.dot(h2.astype(jnp.bfloat16), w3_ref[...],
                  preferred_element_type=jnp.float32)
    o_ref[...] = (out + b3_ref[...]).astype(o_ref.dtype)


def prepare_params(params):
    """One-time weight prep: pad feature dims to 128 multiples, cast weights to
    bf16 (biases stay f32). Do this once, not per forward call."""
    w1, b1 = params["w1"], params["b1"]
    w2, b2 = params["w2"], params["b2"]
    w3, b3 = params["w3"], params["b3"]

    in_f, h1_f = w1.shape
    h2_f, out_f = w2.shape[1], w3.shape[1]
    IN_P, H1_P = _round_up(in_f, LANE), _round_up(h1_f, LANE)
    H2_P, OUT_P = _round_up(h2_f, LANE), _round_up(out_f, LANE)

    pad2 = lambda a, r, c: jnp.pad(a, ((0, r - a.shape[0]), (0, c - a.shape[1])))
    return {
        "w1": pad2(w1, IN_P, H1_P).astype(jnp.bfloat16),
        "w2": pad2(w2, H1_P, H2_P).astype(jnp.bfloat16),
        "w3": pad2(w3, H2_P, OUT_P).astype(jnp.bfloat16),
        "b1": pad2(b1, 1, H1_P).astype(jnp.float32),
        "b2": pad2(b2, 1, H2_P).astype(jnp.float32),
        "b3": pad2(b3, 1, OUT_P).astype(jnp.float32),
        "in_features": in_f,
        "out_features": out_f,
    }


def _choose_batch_tiling(B, tile_b):
    """Return (padded batch, batch tile)."""
    B16 = _round_up(B, SUBLANE_BF16)
    if B16 >= 2 * tile_b:
        # Large batch: full-size tiles; >=2 grid steps so v7x megacore stays busy.
        return _round_up(B, tile_b), tile_b
    if B16 >= 2 * SUBLANE_BF16:
        # Small/medium batch: minimal padding, split into two tiles so both
        # v7x TensorCores get work along the parallel batch axis.
        return B16, B16 // 2
    return B16, B16


def simple_mlp_forward(x, prep, *, tile_b=TILE_B_DEFAULT, out_dtype=jnp.float32):
    """x: [B, input_size] f32; prep: output of prepare_params()."""
    w1p, b1p = prep["w1"], prep["b1"]
    w2p, b2p = prep["w2"], prep["b2"]
    w3p, b3p = prep["w3"], prep["b3"]
    in_f, out_f = prep["in_features"], prep["out_features"]

    B, x_in = x.shape
    assert x_in == in_f, (x_in, in_f)
    IN_P, H1_P = w1p.shape
    H2_P, OUT_P = w3p.shape[0], w3p.shape[1]

    B_P, eff_tile = _choose_batch_tiling(B, tile_b)
    grid = (B_P // eff_tile,)

    # Only the activations are padded/cast per call.
    xp = jnp.pad(x, ((0, B_P - B), (0, IN_P - in_f))).astype(jnp.bfloat16)

    # Weights/biases: constant index_map -> block stays resident across grid
    # steps; single-buffered since the block never changes (halves weight VMEM).
    def resident(a):
        return pl.BlockSpec(a.shape, lambda i: (0,) * a.ndim,
                            pipeline_mode=pl.Buffered(1))

    out_itemsize = jnp.dtype(out_dtype).itemsize
    weight_bytes = sum(int(a.size) * a.dtype.itemsize
                       for a in (w1p, w2p, w3p, b1p, b2p, b3p))
    # x/out double-buffered activation tiles + f32 intermediates.
    act_bytes = eff_tile * (2 * 2 * IN_P + 2 * out_itemsize * OUT_P
                            + 4 * (H1_P + H2_P))
    vmem_limit = min(100 * 1024 * 1024,
                     max(32 * 1024 * 1024, weight_bytes + act_bytes + (4 << 20)))

    flops = 2 * B_P * (IN_P * H1_P + H1_P * H2_P + H2_P * OUT_P)
    bytes_accessed = (int(xp.size) * 2 + weight_bytes
                      + B_P * OUT_P * out_itemsize)

    out_padded = pl.pallas_call(
        mlp_kernel,
        out_shape=jax.ShapeDtypeStruct((B_P, OUT_P), out_dtype),
        grid=grid,
        in_specs=[
            pl.BlockSpec((eff_tile, IN_P), lambda i: (i, 0)),  # x tiled over batch
            resident(w1p), resident(b1p),
            resident(w2p), resident(b2p),
            resident(w3p), resident(b3p),
        ],
        out_specs=pl.BlockSpec((eff_tile, OUT_P), lambda i: (i, 0)),
        compiler_params=pltpu.CompilerParams(
            dimension_semantics=("parallel",),
            vmem_limit_bytes=int(vmem_limit)),
        cost_estimate=pl.CostEstimate(
            flops=flops, transcendentals=0, bytes_accessed=bytes_accessed),
    )(xp, w1p, b1p, w2p, b2p, w3p, b3p)

    # Slice the padded slab back to the true logits.
    return out_padded[:B, :out_f]


def init_params(key, input_size, hidden_size, num_classes):
    # Mimics nn.Linear's uniform(-1/sqrt(fan_in), 1/sqrt(fan_in)) init.
    ks = jax.random.split(key, 6)

    def linear(kw, kb, fan_in, fan_out):
        bound = 1.0 / jnp.sqrt(fan_in)
        w = jax.random.uniform(kw, (fan_in, fan_out), jnp.float32, -bound, bound)
        b = jax.random.uniform(kb, (1, fan_out), jnp.float32, -bound, bound)
        return w, b

    w1, b1 = linear(ks[0], ks[1], input_size, hidden_size)
    w2, b2 = linear(ks[2], ks[3], hidden_size, hidden_size // 2)
    w3, b3 = linear(ks[4], ks[5], hidden_size // 2, num_classes)
    return dict(w1=w1, b1=b1, w2=w2, b2=b2, w3=w3, b3=b3)


if __name__ == "__main__":
    input_size, hidden_size, num_classes = 32, 32, 10
    batch = 32  # exercises a 2-step batch grid with resident weights

    key = jax.random.PRNGKey(0)
    k_params, k_x = jax.random.split(key)
    params = init_params(k_params, input_size, hidden_size, num_classes)
    x = jax.random.normal(k_x, (batch, input_size), jnp.float32)

    prep = prepare_params(params)          # one-time weight padding + bf16 cast
    logits = simple_mlp_forward(x, prep)   # per-call: only x is padded/cast
    jax.block_until_ready(logits)

    # Pure-JAX f32 reference (bf16 operands in the kernel -> relaxed tolerance).
    ref = x
    ref = jnp.maximum(ref @ params["w1"] + params["b1"], 0.0)
    ref = jnp.maximum(ref @ params["w2"] + params["b2"], 0.0)
    ref = ref @ params["w3"] + params["b3"]

    assert logits.shape == (batch, num_classes)
    assert jnp.allclose(logits, ref, atol=2e-2, rtol=2e-2), (
        float(jnp.max(jnp.abs(logits - ref))))

    print("KERNEL_OK")
</pallas_src>

<mosaic_0001>
module attributes {stable_mosaic.version = 11 : i64} {
  func.func @mlp_kernel(%arg0: i32, %arg1: memref<16x128xbf16, #tpu.memory_space<vmem>>, %arg2: memref<128x128xbf16, #tpu.memory_space<vmem>>, %arg3: memref<1x128xf32, #tpu.memory_space<vmem>>, %arg4: memref<128x128xbf16, #tpu.memory_space<vmem>>, %arg5: memref<1x128xf32, #tpu.memory_space<vmem>>, %arg6: memref<128x128xbf16, #tpu.memory_space<vmem>>, %arg7: memref<1x128xf32, #tpu.memory_space<vmem>>, %arg8: memref<16x128xf32, #tpu.memory_space<vmem>>) attributes {dimension_semantics = [#tpu.dimension_semantics<parallel>], iteration_bounds = array<i64: 2>, scalar_prefetch = 0 : i64, scratch_operands = 0 : i64, tpu.core_type = #tpu.core_type<tc>, window_params = [{transform_indices = @transform_0, window_bounds = array<i64: 16, 128>}, {pipeline_mode = #tpu.pipeline_mode<synchronous>, transform_indices = @transform_1, window_bounds = array<i64: 128, 128>}, {pipeline_mode = #tpu.pipeline_mode<synchronous>, transform_indices = @transform_2, window_bounds = array<i64: 1, 128>}, {pipeline_mode = #tpu.pipeline_mode<synchronous>, transform_indices = @transform_3, window_bounds = array<i64: 128, 128>}, {pipeline_mode = #tpu.pipeline_mode<synchronous>, transform_indices = @transform_4, window_bounds = array<i64: 1, 128>}, {pipeline_mode = #tpu.pipeline_mode<synchronous>, transform_indices = @transform_5, window_bounds = array<i64: 128, 128>}, {pipeline_mode = #tpu.pipeline_mode<synchronous>, transform_indices = @transform_6, window_bounds = array<i64: 1, 128>}, {transform_indices = @transform_7, window_bounds = array<i64: 16, 128>}]} {
    %c0 = arith.constant 0 : index
    %c0_0 = arith.constant 0 : index
    %0 = vector.load %arg1[%c0, %c0_0] : memref<16x128xbf16, #tpu.memory_space<vmem>>, vector<16x128xbf16>
    %c0_1 = arith.constant 0 : index
    %c0_2 = arith.constant 0 : index
    %1 = vector.load %arg2[%c0_1, %c0_2] : memref<128x128xbf16, #tpu.memory_space<vmem>>, vector<128x128xbf16>
    %cst = arith.constant dense<0.000000e+00> : vector<16x128xf32>
    %2 = tpu.matmul %0, %1, %cst {dimension_numbers = #tpu.dot_dimension_numbers<[1], [0], [0], [1], [0, 0, 1, 1], [], []>} : vector<16x128xbf16>, vector<128x128xbf16>, vector<16x128xf32> -> vector<16x128xf32>
    %c0_3 = arith.constant 0 : index
    %c0_4 = arith.constant 0 : index
    %3 = vector.load %arg3[%c0_3, %c0_4] : memref<1x128xf32, #tpu.memory_space<vmem>>, vector<1x128xf32>
    %4 = vector.broadcast %3 : vector<1x128xf32> to vector<16x128xf32>
    %5 = arith.addf %2, %4 : vector<16x128xf32>
    %cst_5 = arith.constant 0.000000e+00 : f32
    %6 = vector.broadcast %cst_5 : f32 to vector<16x128xf32>
    %7 = arith.maximumf %5, %6 : vector<16x128xf32>
    %8 = arith.truncf %7 : vector<16x128xf32> to vector<16x128xbf16>
    %c0_6 = arith.constant 0 : index
    %c0_7 = arith.constant 0 : index
    %9 = vector.load %arg4[%c0_6, %c0_7] : memref<128x128xbf16, #tpu.memory_space<vmem>>, vector<128x128xbf16>
    %cst_8 = arith.constant dense<0.000000e+00> : vector<16x128xf32>
    %10 = tpu.matmul %8, %9, %cst_8 {dimension_numbers = #tpu.dot_dimension_numbers<[1], [0], [0], [1], [0, 0, 1, 1], [], []>} : vector<16x128xbf16>, vector<128x128xbf16>, vector<16x128xf32> -> vector<16x128xf32>
    %c0_9 = arith.constant 0 : index
    %c0_10 = arith.constant 0 : index
    %11 = vector.load %arg5[%c0_9, %c0_10] : memref<1x128xf32, #tpu.memory_space<vmem>>, vector<1x128xf32>
    %12 = vector.broadcast %11 : vector<1x128xf32> to vector<16x128xf32>
    %13 = arith.addf %10, %12 : vector<16x128xf32>
    %cst_11 = arith.constant 0.000000e+00 : f32
    %14 = vector.broadcast %cst_11 : f32 to vector<16x128xf32>
    %15 = arith.maximumf %13, %14 : vector<16x128xf32>
    %16 = arith.truncf %15 : vector<16x128xf32> to vector<16x128xbf16>
    %c0_12 = arith.constant 0 : index
    %c0_13 = arith.constant 0 : index
    %17 = vector.load %arg6[%c0_12, %c0_13] : memref<128x128xbf16, #tpu.memory_space<vmem>>, vector<128x128xbf16>
    %cst_14 = arith.constant dense<0.000000e+00> : vector<16x128xf32>
    %18 = tpu.matmul %16, %17, %cst_14 {dimension_numbers = #tpu.dot_dimension_numbers<[1], [0], [0], [1], [0, 0, 1, 1], [], []>} : vector<16x128xbf16>, vector<128x128xbf16>, vector<16x128xf32> -> vector<16x128xf32>
    %c0_15 = arith.constant 0 : index
    %c0_16 = arith.constant 0 : index
    %19 = vector.load %arg7[%c0_15, %c0_16] : memref<1x128xf32, #tpu.memory_space<vmem>>, vector<1x128xf32>
    %20 = vector.broadcast %19 : vector<1x128xf32> to vector<16x128xf32>
    %21 = arith.addf %18, %20 : vector<16x128xf32>
    %c0_17 = arith.constant 0 : index
    %c0_18 = arith.constant 0 : index
    %22 = vector.load %arg8[%c0_17, %c0_18] : memref<16x128xf32, #tpu.memory_space<vmem>>, vector<16x128xf32>
    tpu.vector_store %arg8[%c0_17, %c0_18], %21 {strides = array<i32>} : memref<16x128xf32, #tpu.memory_space<vmem>>, vector<16x128xf32>,
    return
  }
  func.func @transform_0(%arg0: i32) -> (i32, i32) {
    %c0_i32 = arith.constant 0 : i32
    %c0_i32_0 = arith.constant 0 : i32
    return %arg0, %c0_i32 : i32, i32
  }
  func.func @transform_1(%arg0: i32) -> (i32, i32) {
    %c0_i32 = arith.constant 0 : i32
    %c0_i32_0 = arith.constant 0 : i32
    %c0_i32_1 = arith.constant 0 : i32
    return %c0_i32, %c0_i32_0 : i32, i32
  }
  func.func @transform_2(%arg0: i32) -> (i32, i32) {
    %c0_i32 = arith.constant 0 : i32
    %c0_i32_0 = arith.constant 0 : i32
    %c0_i32_1 = arith.constant 0 : i32
    return %c0_i32, %c0_i32_0 : i32, i32
  }
  func.func @transform_3(%arg0: i32) -> (i32, i32) {
    %c0_i32 = arith.constant 0 : i32
    %c0_i32_0 = arith.constant 0 : i32
    %c0_i32_1 = arith.constant 0 : i32
    return %c0_i32, %c0_i32_0 : i32, i32
  }
  func.func @transform_4(%arg0: i32) -> (i32, i32) {
    %c0_i32 = arith.constant 0 : i32
    %c0_i32_0 = arith.constant 0 : i32
    %c0_i32_1 = arith.constant 0 : i32
    return %c0_i32, %c0_i32_0 : i32, i32
  }
  func.func @transform_5(%arg0: i32) -> (i32, i32) {
    %c0_i32 = arith.constant 0 : i32
    %c0_i32_0 = arith.constant 0 : i32
    %c0_i32_1 = arith.constant 0 : i32
    return %c0_i32, %c0_i32_0 : i32, i32
  }
  func.func @transform_6(%arg0: i32) -> (i32, i32) {
    %c0_i32 = arith.constant 0 : i32
    %c0_i32_0 = arith.constant 0 : i32
    %c0_i32_1 = arith.constant 0 : i32
    return %c0_i32, %c0_i32_0 : i32, i32
  }
  func.func @transform_7(%arg0: i32) -> (i32, i32) {
    %c0_i32 = arith.constant 0 : i32
    %c0_i32_0 = arith.constant 0 : i32
    return %arg0, %c0_i32 : i32, i32
  }
}

</mosaic_0001>

<bundles_post_ra>
// kernel: tpu_custom_call.1
= control target key start
LH: loop header
LB: loop body
LE: loop exit
PB: predicated region body
PF: predicated region fallthrough
CT: control target
= control target key end

     0   :  { %s1385_s0 = inlined_call_operand.hbm [shape: bf16[32,128], index: 0, kind: input, shape index: {}]   ;;  %s1386_s1 = inlined_call_operand.hbm [shape: bf16[128,128], index: 1, kind: input, shape index: {}]   ;;  %s1387_s2 = inlined_call_operand.vmem [shape: f32[1,128], index: 2, kind: input, shape index: {}]   ;;  %s1388_s3 = inlined_call_operand.hbm [shape: bf16[128,128], index: 3, kind: input, shape index: {}]   ;;  %s1389_s4 = inlined_call_operand.vmem [shape: f32[1,128], index: 4, kind: input, shape index: {}]   ;;  %s1390_s5 = inlined_call_operand.hbm [shape: bf16[128,128], index: 5, kind: input, shape index: {}]   ;;  %s1391_s6 = inlined_call_operand.vmem [shape: f32[1,128], index: 6, kind: input, shape index: {}]   ;;  %s1392_s7 = inlined_call_operand.hbm [shape: f32[32,128], index: 7, kind: output, shape index: {}]  }
   0x1   :  { %1395 = sst [smem:[#allocation15_spill]] %s1386_s1 }
   0x2   :  { %12 = vsyncpa [#allocation3], 0 }
   0x3   :  { %14 = vsyncpa [#allocation3 + $0x1], 0 }
   0x4   :  { %15 = vsyncpa [#allocation6], 0 }
   0x5   :  { %16 = vsyncpa [#allocation9], 0 }
   0x6   :  { %17 = vsyncpa [#allocation4], 0 }
   0x7   :  { %19 = vsyncpa [#allocation4 + $0x1], 0  ;;  %s1205_s24 = smov 0   ;;  %s1207_s25 = smov 0  }
   0x8   :  { %s1209_s26 = smov 0   ;;  %s1211_s27 = smov 0  }
   0x9 LB: > { %s1226_s28 = sadd.s32 4294967295, %s1156_s27   ;;  %s731_s29 = sadd.s32 4294967294, %s1156_s27   ;;  %s1156_s27 = sphi %s1211_s27, %s1409_s27   ;;  %s1152_s26 = sphi %s1209_s26, %s1408_s26   ;;  %s1148_s25 = sphi %s1207_s25, %s1407_s25   ;;  %s1144_s24 = sphi %s1205_s24, %s1406_s24  }
   0xa   : > { %p45_p0 = scmp.ne.s32.totalorder %s1148_s25, %s1144_s24  ;;  %p46_p1 = scmp.eq.s32.totalorder %s1226_s28, 0 }
   0xb   : > { %p195_p2 = scmp.eq.s32.totalorder %s1226_s28, 1  ;;  %p201_p3 = scmp.eq.s32.totalorder %s731_s29, 1 }
   0xc   : > { %p1235_p4 = por %p46_p1, %p45_p0  ;;  %p732_p5 = scmp.ge.s32.totalorder %s1156_s27, 1 }
   0xd   : > { %p1240_p6 = por %p201_p3, %p45_p0  ;;  %p208_p7 = scmp.lt.s32.totalorder %s1156_s27, 3 }
   0xe   : > { %s1398_s1 = sld [smem:[#allocation15_spill]]  ;;  %s1158_s13 = smov [#allocation5]  }
   0xf   : > { %p1248_p8 = pnand %p732_p5, %p208_p7  ;;  %s221_s14 = sshll.u32 %s1158_s13, 4  ;;  %s222_s14 = int_to_ptr.vmem [resolvable:$true] %s221_s14 }
  0x10   : > { %s236_s18 = sshll.u32 %s1388_s3, 4  ;;  %s1393_s19 = smov 64   ;;  %s237_s18 = int_to_ptr.hbm [resolvable:$true] %s236_s18 }
  0x11   : > { %p894_p9 = pneg %p1248_p8  ;;  %s1394_s20 = smov 4  }
  0x12   : > { %s1161_s21 = smov [#allocation7]   ;;  %s253_s9 = sshll.u32 %s1390_s5, 4  ;;  %s254_s9 = int_to_ptr.hbm [resolvable:$true] %s253_s9 }
  0x13   : > { %p1256_p10 = pnand %p894_p9, %p46_p1  ;;  %s238_s22 = sshll.u32 %s1161_s21, 4  ;;  %s239_s22 = int_to_ptr.vmem [resolvable:$true] %s238_s22 }
  0x14   : > { %s219_s11 = sshll.u32 %s1398_s1, 4  ;;  %s1162_s10 = smov [#allocation8]   ;;  %s220_s11 = int_to_ptr.hbm [resolvable:$true] %s219_s11 }
  0x15   : > { %897 = dma.hbm_to_vmem [thread:$0]  (!%p1256_p10), %s220_s11, 1024, %s222_s14, [#allocation6], %s1393_s19, %s1393_s19, %s1394_s20  }
  0x16   : > { %900 = dma.hbm_to_vmem [thread:$0]  (!%p1256_p10), %s237_s18, 1024, %s239_s22, [#allocation6], %s1393_s19, %s1393_s19, %s1394_s20  }
  0x17   : > { %s255_s11 = sshll.u32 %s1162_s10, 4  ;;  %s1278_s13 = sadd.s32 1, %s1156_s27   ;;  %s256_s11 = int_to_ptr.vmem [resolvable:$true] %s255_s11 }
  0x18   : > { %903 = dma.hbm_to_vmem [thread:$0]  (!%p1256_p10), %s254_s9, 1024, %s256_s11, [#allocation9], %s1393_s19, %s1393_s19, %s1394_s20  }
  0x19   : > { %s29_s14 = ssub.s32 %s1156_s27, %s1278_s13  ;;  %s32_s16 = sadd.s32 1, %s1152_s26 }
  0x1a   : > { %p30_p12 = scmp.eq.s32.totalorder %s29_s14, 0  ;;  %p39_p13 = scmp.ne.s32.totalorder %s1152_s26, %s1148_s25 }
  0x1b   : > { %p40_p0 = scmp.eq.s32.totalorder %s1156_s27, 0  ;;  %p915_p5 = scmp.lt.s32.totalorder %s1156_s27, 2 }
  0x1c   : > { %s1292_s17 = scalar_select %p30_p12, %s1152_s26, %s32_s16  }
  0x1d   : > { %p1296_p3 = por %p195_p2, %p39_p13  ;;  %s272_s21 = sand.u32 1, %s1152_s26  }
  0x1e   : > { %s851_s15 = sshll.u32 %s1156_s27, 3  ;;  %p41_p7 = por %p40_p0, %p39_p13 }
  0x1f   : > { %s737_s22 = sshll.u32 %s272_s21, 3  ;;  %s281_s9 = scalar_lea.hbm %s1385_s0, %s851_s15 }
  0x20   : > { %s282_s10 = sshll.u32 %s281_s9, 4  ;;  %s276_s11 = scalar_lea.vmem [#allocation2], %s737_s22  ;;  %s283_s10 = int_to_ptr.hbm [resolvable:$true] %s282_s10 }
  0x21   : > { %s284_s14 = sshll.u32 %s276_s11, 4  ;;  %p1306_p9 = pnand %p915_p5, %p41_p7  ;;  %s285_s14 = int_to_ptr.vmem [resolvable:$true] %s284_s14 }
  0x22   : > { %s273_s19 = scalar_lea.sflag [#allocation3], %s272_s21  ;;  %s1052_s20 = sshra.s32 %s283_s10, 4  ;;  %s1053_s20 = int_to_ptr.hbm [resolvable:$true] %s1052_s20 }
  0x23   : > { %s1054_s1 = scalar_lea.hbm %s1053_s20, 8  ;;  %p1056_p10 = pneg %p1306_p9 }
  0x24   : > { %p1055_p2 = scmp.ne.s32.totalorder %s1053_s20, %s1054_s1  ;;  %s1059_s22 = scalar_lea.hbm %s1385_s0, 16 }
  0x25   : > { %p1060_p0 = scmp.lt.s32.totalorder %s1053_s20, %s1385_s0  ;;  %p1061_p5 = scmp.lt.s32.totalorder %s1059_s22, %s1054_s1 }
  0x26   : > { %p1057_p12 = pnand %p1056_p10, %p1055_p2 }
  0x27   : > { %p1062_p7 = por %p1061_p5, %p1060_p0 }
  0x28   : > { %p1058_p13 = pneg %p1057_p12 }
  0x2a   : > { %p1063_p11 = pnand %p1062_p7, %p1058_p13 }
  0x2c   : > { %1066 = shalt.err (!%p1063_p11)
}
  0x2d   : > { %s1403_s21 = smov 4   ;;  %s1404_s11 = smov 64  }
  0x2e   : > { %907 = dma.hbm_to_vmem [thread:$0]  (!%p1306_p9), %s283_s10, 128, %s285_s14, %s273_s19, %s1404_s11, %s1404_s11, %s1403_s21  }
  0x2f   : > { %296 = sbr.rel (%p1248_p8) target bundleno = 515 (0x203), region = 48  ;;  %s1326_s15 = sand.u32 (!%p1248_p8), 1, %s1148_s25  }
  0x30   : > { %s741_s20 = sshll.u32 (!%p1248_p8), %s1326_s15, 3  ;;  %s299_s1 = scalar_lea.sflag (!%p1248_p8), [#allocation3], %s1326_s15 }
  0x31   : > { %s302_s23 = scalar_lea.vmem (!%p1248_p8), [#allocation2], %s741_s20 }
  0x34   : > { %1127 = dma.done.wait (%p1235_p4), %s299_s1, 128  }
  0x35   : > { %1129 = vsyncadd (%p1235_p4), %s299_s1, 4294967168 }
  0x36   : > { %1131 = dma.done.wait (%p46_p1), [#allocation6], 2048  }
  0x37   : > { %1133 = vsyncadd (%p46_p1), [#allocation6], 4294965248 }
  0x38   : > { %1135 = dma.done.wait (%p46_p1), [#allocation9], 1024  }
  0x39   : > { %1137 = vsyncadd (%p46_p1), [#allocation9], 4294966272  ;;  %v860_v0 = vld [vmem:[#allocation5 + $0x38] sm:$0xff]  ;;  %v859_v1 = vld [vmem:[#allocation5 + $0x30] sm:$0xff]  ;;  %s745_s14 = sshll.u32 %s1326_s15, 4  ;;  %s877_s29 = sshll.u32 %s1226_s28, 4 }
  0x3a   : > { %427 = vmatpush.bf16.msra.mxu0 %v860_v0  ;;  %v868_v2 = vld [vmem:[#allocation7 + $0x38] sm:$0xff]  ;;  %v867_v3 = vld [vmem:[#allocation7 + $0x30] sm:$0xff]  ;;  %v858_v4 = vld [vmem:[#allocation5 + $0x28] sm:$0xff]  ;;  %s625_s11 = scalar_lea.hbm %s1392_s7, %s877_s29  ;;  %s348_s20 = scalar_lea.vmem [#allocation10], %s745_s14 }
  0x3b   : > { %512 = vmatpush.bf16.msra.mxu1 %v868_v2  ;;  %v866_v5 = vld [vmem:[#allocation7 + $0x28] sm:$0xff]  ;;  %v857_v6 = vld [vmem:[#allocation5 + $0x20] sm:$0xff]  ;;  %v856_v8 = vld [vmem:[#allocation5 + $0x18] sm:$0xff]  ;;  %s626_s1 = sshll.u32 %s348_s20, 4  ;;  %s614_s30 = scalar_lea.sflag [#allocation4], %s1326_s15  ;;  %s627_s1 = int_to_ptr.vmem [resolvable:$true] %s626_s1 }
  0x3c   : > { %v865_v7 = vld [vmem:[#allocation7 + $0x20] sm:$0xff]  ;;  %v855_v9 = vld [vmem:[#allocation5 + $0x10] sm:$0xff]  ;;  %v854_v10 = vld [vmem:[#allocation5 + $0x8] sm:$0xff]  ;;  %s1102_s14 = scalar_lea.hbm %s1392_s7, 32 }
  0x3d   : > { %v853_v11 = vld [vmem:[#allocation5] sm:$0xff]  ;;  %v852_v12 = vld [vmem:[%s302_s23] sm:$0xff]  ;;  %v862_v15 = vld [vmem:[#allocation7 + $0x8] sm:$0xff]  ;;  %s628_s23 = sshll.u32 %s625_s11, 4  ;;  %s629_s23 = int_to_ptr.hbm [resolvable:$true] %s628_s23 }
  0x3e   : > { %428 = vmatpush.bf16.msra.mxu0 %v859_v1  ;;  %v864_v13 = vld [vmem:[#allocation7 + $0x18] sm:$0xff]  ;;  %v863_v14 = vld [vmem:[#allocation7 + $0x10] sm:$0xff]  ;;  %v861_v16 = vld [vmem:[#allocation7] sm:$0xff]  ;;  %s1096_s12 = sshra.s32 %s629_s23, 4  ;;  %s1097_s12 = int_to_ptr.hbm [resolvable:$true] %s1096_s12 }
  0x3f   : > { %513 = vmatpush.bf16.msra.mxu1 %v867_v3  ;;  %v876_v17 = vld [vmem:[#allocation8 + $0x38] sm:$0xff]  ;;  %v875_v18 = vld [vmem:[#allocation8 + $0x30] sm:$0xff]  ;;  %v874_v19 = vld [vmem:[#allocation8 + $0x28] sm:$0xff]  ;;  %s1098_s28 = scalar_lea.hbm %s1097_s12, 16  ;;  %p1103_p11 = scmp.lt.s32.totalorder %s1097_s12, %s1392_s7 }
  0x40   : > { %597 = vmatpush.bf16.msra.mxu2 %v876_v17  ;;  %v873_v20 = vld [vmem:[#allocation8 + $0x20] sm:$0xff]  ;;  %v959_v22 = vld [vmem:[%s1387_s2] ss:$0 sm:$0xff]  ;;  %v872_v29 = vld [vmem:[#allocation8 + $0x18] sm:$0xff]  ;;  %p1099_p1 = scmp.ne.s32.totalorder %s1097_s12, %s1098_s28  ;;  %p1104_p9 = scmp.lt.s32.totalorder %s1102_s14, %s1098_s28 }
  0x41   : > { %v871_v30 = vld [vmem:[#allocation8 + $0x10] sm:$0xff]  ;;  %v870_v31 = vld [vmem:[#allocation8 + $0x8] sm:$0xff]  ;;  %v869_v32 = vld [vmem:[#allocation8] sm:$0xff] }
  0x42   : > { %429 = vmatpush.bf16.msra.mxu0 %v858_v4  ;;  %v960_v34 = vld [vmem:[%s1389_s4] ss:$0 sm:$0xff]  ;;  %p1100_p4 = pnand %p1099_p1, %p1296_p3  ;;  %p1105_p2 = por %p1104_p9, %p1103_p11 }
  0x43   : > { %514 = vmatpush.bf16.msra.mxu1 %v866_v5  ;;  %v961_v41 = vld [vmem:[%s1391_s6] ss:$0 sm:$0xff] }
  0x44   : > { %598 = vmatpush.bf16.msra.mxu2 %v875_v18  ;;  %p1101_p8 = pneg %p1100_p4 }
  0x46   : > { %430 = vmatpush.bf16.msra.mxu0 %v857_v6  ;;  %p1106_p10 = pnand %p1105_p2, %p1101_p8 }
  0x47   : > { %515 = vmatpush.bf16.msra.mxu1 %v865_v7 }
  0x48   : > { %599 = vmatpush.bf16.msra.mxu2 %v874_v19 }
  0x4a   : > { %431 = vmatpush.bf16.msra.mxu0 %v856_v8 }
  0x4b   : > { %516 = vmatpush.bf16.msra.mxu1 %v864_v13 }
  0x4c   : > { %600 = vmatpush.bf16.msra.mxu2 %v873_v20 }
  0x4e   : > { %432 = vmatpush.bf16.msra.mxu0 %v855_v9 }
  0x4f   : > { %517 = vmatpush.bf16.msra.mxu1 %v863_v14 }
  0x50   : > { %601 = vmatpush.bf16.msra.mxu2 %v872_v29 }
  0x52   : > { %433 = vmatpush.bf16.msra.mxu0 %v854_v10 }
  0x53   : > { %518 = vmatpush.bf16.msra.mxu1 %v862_v15 }
  0x54   : > { %602 = vmatpush.bf16.msra.mxu2 %v871_v30 }
  0x56   : > { %434 = vmatpush.bf16.msra.mxu0 %v853_v11 }
  0x57   : > { %519 = vmatpush.bf16.msra.mxu1 %v861_v16 }
  0x58   : > { %603 = vmatpush.bf16.msra.mxu2 %v870_v31 }
  0x59   : > { %435 = vmatmul.bf16.vlgmr.msra.gmra.mxu0 %v852_v12 }
  0x5c   : > { %604 = vmatpush.bf16.msra.mxu2 %v869_v32 }
  0xd6   : > { %v436_v21 = vpop.f32.mrf.mxu0 }
  0xd7   : > { %v437_v23 = vadd.f32 %v959_v22, %v436_v21 }
  0xd9   : > { %v441_v26 = vmax.f32 %v437_v23, 0.0 }
  0xde   : > { %v438_v24 = vpop.f32.mrf.mxu0 }
  0xdf   : > { %v439_v25 = vadd.f32 %v959_v22, %v438_v24 }
  0xe1   : > { %v442_v27 = vmax.f32 %v439_v25, 0.0 }
  0xe3   : > { %v443_v28 = vpack.c.bf16 %v442_v27, %v441_v26 }
  0xe5   : > { %520 = vmatmul.bf16.vlgmr.msra.gmra.mxu1 %v443_v28 }
 0x162   : > { %v521_v33 = vpop.f32.mrf.mxu1 }
 0x163   : > { %v522_v35 = vadd.f32 %v960_v34, %v521_v33 }
 0x165   : > { %v526_v38 = vmax.f32 %v522_v35, 0.0 }
 0x16a   : > { %v523_v36 = vpop.f32.mrf.mxu1 }
 0x16b   : > { %v524_v37 = vadd.f32 %v960_v34, %v523_v36 }
 0x16d   : > { %v527_v39 = vmax.f32 %v524_v37, 0.0 }
 0x16f   : > { %v528_v40 = vpack.c.bf16 %v527_v39, %v526_v38 }
 0x171   : > { %605 = vmatmul.bf16.vlgmr.msra.gmra.mxu2 %v528_v40 }
 0x1f4   : > { %v606_v42 = vpop.f32.mrf.mxu2 }
 0x1f5   : > { %v607_v43 = vadd.f32 %v961_v41, %v606_v42 }
 0x1f7   : > { %611 = vst [vmem:[%s348_s20] sm:$0xff] %v607_v43 }
 0x1fc   : > { %v608_v44 = vpop.f32.mrf.mxu2 }
 0x1fd   : > { %v609_v45 = vadd.f32 %v961_v41, %v608_v44 }
 0x1ff   : > { %612 = vst [vmem:[%s348_s20 + $0x8] sm:$0xff] %v609_v45 }
 0x200   : > { %1109 = shalt.err (!%p1106_p10)
}
 0x201   : > { %s1163_s15 = smov 128   ;;  %s1164_s29 = smov 8  }
 0x202   : > { %892 = dma.vmem_to_hbm [thread:$0]  (%p1296_p3), %s627_s1, 256, %s629_s23, %s614_s30, %s1163_s15, %s1163_s15, %s1164_s29  }
 0x203 PF: > { %s643_s9 = sand.u32 1, %s1144_s24   ;;  %p1405_p12 = scmp.ge.s32.totalorder %s1156_s27, 2 }
 0x204   : > { %s644_s21 = scalar_lea.sflag [#allocation4], %s643_s9 }
 0x205   : > { %p909_p13 = pnand %p1405_p12, %p1240_p6 }
 0x207   : > { %p910_p0 = pneg %p909_p13 }
 0x209   : > { %1139 = dma.done.wait (%p910_p0), %s644_s21, 256  }
 0x20a   : > { %1141 = vsyncadd (%p910_p0), %s644_s21, 4294967040  ;;  %p22_p5 = scmp.ge.s32.totalorder %s1278_s13, 4   ;;  %s1406_s24 = smov %s1148_s25 }
 0x20b   : > { %s1407_s25 = smov %s1152_s26  ;;  %s1408_s26 = smov %s1292_s17 }
 0x20c   : > { %s1409_s27 = smov %s1278_s13  ;;  %24 = sbr.rel (!%p22_p5) target bundleno = 9 (0x9), region = 105 }
 0x211   :  { %650 = vsyncpa [#allocation3], 1 }
 0x212   :  { %652 = vsyncpa [#allocation3 + $0x1], 1 }
 0x213   :  { %653 = vsyncpa [#allocation6], 1 }
 0x214   :  { %654 = vsyncpa [#allocation9], 1 }
 0x215   :  { %655 = vsyncpa [#allocation4], 1 }
 0x216   :  { %657 = vsyncpa [#allocation4 + $0x1], 1 }

</bundles_post_ra>
